<compile_context>
chip_gen: v7x
topology: tpu7x:2x2x1
jax: 0.10.0
libtpu: 0.0.40
codegen_flags: <defaults>
</compile_context>

<pallas_src>
import jax
import jax.numpy as jnp
from jax.experimental import pallas as pl
from jax.experimental.pallas import tpu as pltpu


def _resblock_kernel(x_ref, w_ref, b_ref, o_ref):
    # x_ref: (1, D, tl)   w_ref: (D2, D)   b_ref: (D2, 1)   o_ref: (1, D2, tl)
    x = x_ref[0]                                                   # (D, tl), native dtype
    y = jnp.dot(w_ref[...], x, preferred_element_type=jnp.float32)  # (D2, tl) f32 acc
    y = y + b_ref[...]                                             # broadcast (D2, 1)
    o_ref[0] = y.astype(o_ref.dtype)


def resblock_forward(x_ncl, w1, b1, w2, b2, w3, b3, *, tl=None):
    """x_ncl: (N, D, L); weights in PyTorch Conv1d layout:
       w1: (D1, D, 1), w2: (D2, D1, 1), w3: (D2, D, 1); b_i: (C_out,)."""
    N, D, L = x_ncl.shape
    D2 = w2.shape[0]

    # ---- Fold the three pointwise convs into one affine map (f32) --------
    W1 = w1[:, :, 0].astype(jnp.float32)        # (D1, D)
    W2 = w2[:, :, 0].astype(jnp.float32)        # (D2, D1)
    W3 = w3[:, :, 0].astype(jnp.float32)        # (D2, D)
    Wf = W2 @ W1 + W3                           # (D2, D)
    bf = (W2 @ b1.astype(jnp.float32)
          + b2.astype(jnp.float32)
          + b3.astype(jnp.float32)).reshape(D2, 1)

    # ---- Choose the lane tile along L (VMEM-budgeted, works on v7x 64MiB) -
    if tl is None:
        vmem_budget = 24 * 1024 * 1024                 # headroom vs 32 MiB scoped
        bytes_per_lane_col = 2 * (D + D2) * 4          # double-buffered in+out, f32
        max_tl = max(128, vmem_budget // bytes_per_lane_col)
        tl = min(1024, (max_tl // 128) * 128)
    tl = max(128, min(tl, pl.cdiv(L, 128) * 128))      # never wider than (padded) L

    # ---- Pad ragged L up to a multiple of the tile, slice back at the end -
    Lp = pl.cdiv(L, tl) * tl
    if Lp != L:
        x_ncl = jnp.pad(x_ncl, ((0, 0), (0, 0), (0, Lp - L)))

    grid = (N, Lp // tl)

    out = pl.pallas_call(
        _resblock_kernel,
        out_shape=jax.ShapeDtypeStruct((N, D2, Lp), x_ncl.dtype),
        grid_spec=pltpu.PrefetchScalarGridSpec(
            num_scalar_prefetch=0,
            grid=grid,
            in_specs=[
                pl.BlockSpec((1, D, tl), lambda n, j: (n, 0, j)),   # x tile (L on lanes)
                pl.BlockSpec((D2, D), lambda n, j: (0, 0)),         # folded weight
                pl.BlockSpec((D2, 1), lambda n, j: (0, 0)),         # folded bias
            ],
            out_specs=pl.BlockSpec((1, D2, tl), lambda n, j: (n, 0, j)),
        ),
        compiler_params=pltpu.CompilerParams(
            dimension_semantics=("parallel", "parallel"),
            vmem_limit_bytes=32 * 1024 * 1024,
        ),
    )(x_ncl, Wf, bf)

    return out[:, :, :L] if Lp != L else out


def _ref_forward(x_ncl, w1, b1, w2, b2, w3, b3):
    # Pure-JAX reference of the (unfolded) PyTorch forward.
    def conv1x1(x, w, b):
        return jnp.einsum('ncl,oc->nol', x, w[:, :, 0]) + b[None, :, None]
    x1 = conv1x1(x_ncl, w1, b1)
    x1 = conv1x1(x1, w2, b2)
    xs = conv1x1(x_ncl, w3, b3)
    return xs + x1


if __name__ == "__main__":
    # Small shapes consistent with the module: D -> D1 -> D2 over length-L sequences.
    N, D, D1, D2, L = 2, 8, 16, 8, 512

    key = jax.random.PRNGKey(0)
    ks = jax.random.split(key, 8)

    def u(k, shape, fan_in):
        bound = 1.0 / (fan_in ** 0.5)
        return jax.random.uniform(k, shape, jnp.float32, -bound, bound)

    x = jax.random.normal(ks[0], (N, D, L), dtype=jnp.float32)
    w1 = u(ks[1], (D1, D, 1), D)
    b1 = u(ks[2], (D1,), D)
    w2 = u(ks[3], (D2, D1, 1), D1)
    b2 = u(ks[4], (D2,), D1)
    w3 = u(ks[5], (D2, D, 1), D)
    b3 = u(ks[6], (D2,), D)

    out = jax.block_until_ready(resblock_forward(x, w1, b1, w2, b2, w3, b3))
    ref = _ref_forward(x, w1, b1, w2, b2, w3, b3)
    assert out.shape == (N, D2, L)
    # folded-vs-unfolded differs only by fp reassociation
    assert jnp.allclose(out, ref, atol=1e-4, rtol=1e-4), "mismatch vs reference"

    # Ragged L (not a multiple of 128) exercises the padded-tail path.
    L2 = 200
    x2 = jax.random.normal(ks[7], (N, D, L2), dtype=jnp.float32)
    out2 = jax.block_until_ready(resblock_forward(x2, w1, b1, w2, b2, w3, b3))
    ref2 = _ref_forward(x2, w1, b1, w2, b2, w3, b3)
    assert out2.shape == (N, D2, L2)
    assert jnp.allclose(out2, ref2, atol=1e-4, rtol=1e-4), "mismatch vs reference (ragged L)"

    print("KERNEL_OK")
</pallas_src>

<mosaic_0001>
module attributes {stable_mosaic.version = 11 : i64} {
  func.func @_resblock_kernel(%arg0: i32, %arg1: i32, %arg2: memref<1x8x512xf32, #tpu.memory_space<vmem>>, %arg3: memref<8x8xf32, #tpu.memory_space<vmem>>, %arg4: memref<8x1xf32, #tpu.memory_space<vmem>>, %arg5: memref<1x8x512xf32, #tpu.memory_space<vmem>>) attributes {dimension_semantics = [#tpu.dimension_semantics<parallel>, #tpu.dimension_semantics<parallel>], iteration_bounds = array<i64: 2, 1>, scalar_prefetch = 0 : i64, scratch_operands = 0 : i64, tpu.core_type = #tpu.core_type<tc>, window_params = [{transform_indices = @transform_0, window_bounds = array<i64: 1, 8, 512>}, {pipeline_mode = #tpu.pipeline_mode<synchronous>, transform_indices = @transform_1, window_bounds = array<i64: 8, 8>}, {pipeline_mode = #tpu.pipeline_mode<synchronous>, transform_indices = @transform_2, window_bounds = array<i64: 8, 1>}, {transform_indices = @transform_3, window_bounds = array<i64: 1, 8, 512>}]} {
    %c0 = arith.constant 0 : index
    %c0_0 = arith.constant 0 : index
    %c0_1 = arith.constant 0 : index
    %0 = vector.load %arg2[%c0, %c0_0, %c0_1] : memref<1x8x512xf32, #tpu.memory_space<vmem>>, vector<1x8x512xf32>
    %1 = vector.shape_cast %0 : vector<1x8x512xf32> to vector<8x512xf32>
    %c0_2 = arith.constant 0 : index
    %c0_3 = arith.constant 0 : index
    %2 = vector.load %arg3[%c0_2, %c0_3] : memref<8x8xf32, #tpu.memory_space<vmem>>, vector<8x8xf32>
    %cst = arith.constant dense<0.000000e+00> : vector<8x512xf32>
    %3 = tpu.matmul %2, %1, %cst {dimension_numbers = #tpu.dot_dimension_numbers<[1], [0], [0], [1], [0, 0, 1, 1], [], []>} : vector<8x8xf32>, vector<8x512xf32>, vector<8x512xf32> -> vector<8x512xf32>
    %c0_4 = arith.constant 0 : index
    %c0_5 = arith.constant 0 : index
    %4 = vector.load %arg4[%c0_4, %c0_5] : memref<8x1xf32, #tpu.memory_space<vmem>>, vector<8x1xf32>
    %5 = vector.broadcast %4 : vector<8x1xf32> to vector<8x512xf32>
    %6 = arith.addf %3, %5 : vector<8x512xf32>
    %c0_6 = arith.constant 0 : index
    %c0_7 = arith.constant 0 : index
    %c0_8 = arith.constant 0 : index
    %7 = vector.load %arg5[%c0_6, %c0_7, %c0_8] : memref<1x8x512xf32, #tpu.memory_space<vmem>>, vector<1x8x512xf32>
    %8 = vector.shape_cast %7 : vector<1x8x512xf32> to vector<8x512xf32>
    %9 = vector.shape_cast %6 : vector<8x512xf32> to vector<1x8x512xf32>
    tpu.vector_store %arg5[%c0_6, %c0_7, %c0_8], %9 {strides = array<i32>} : memref<1x8x512xf32, #tpu.memory_space<vmem>>, vector<1x8x512xf32>,
    return
  }
  func.func @transform_0(%arg0: i32, %arg1: i32) -> (i32, i32, i32) {
    %c0_i32 = arith.constant 0 : i32
    %c0_i32_0 = arith.constant 0 : i32
    return %arg0, %c0_i32, %arg1 : i32, i32, i32
  }
  func.func @transform_1(%arg0: i32, %arg1: i32) -> (i32, i32) {
    %c0_i32 = arith.constant 0 : i32
    %c0_i32_0 = arith.constant 0 : i32
    %c0_i32_1 = arith.constant 0 : i32
    return %c0_i32, %c0_i32_0 : i32, i32
  }
  func.func @transform_2(%arg0: i32, %arg1: i32) -> (i32, i32) {
    %c0_i32 = arith.constant 0 : i32
    %c0_i32_0 = arith.constant 0 : i32
    %c0_i32_1 = arith.constant 0 : i32
    return %c0_i32, %c0_i32_0 : i32, i32
  }
  func.func @transform_3(%arg0: i32, %arg1: i32) -> (i32, i32, i32) {
    %c0_i32 = arith.constant 0 : i32
    %c0_i32_0 = arith.constant 0 : i32
    return %arg0, %c0_i32, %arg1 : i32, i32, i32
  }
}

</mosaic_0001>

<bundles_post_ra>
// kernel: tpu_custom_call.1
= control target key start
LH: loop header
LB: loop body
LE: loop exit
PB: predicated region body
PF: predicated region fallthrough
CT: control target
= control target key end

     0   :  { %8 = vsyncpa [#allocation3], 0  ;;  %s869_s0 = inlined_call_operand.hbm [shape: f32[2,8,512], index: 0, kind: input, shape index: {}]   ;;  %s870_s1 = inlined_call_operand.vmem [shape: f32[8,8], index: 1, kind: input, shape index: {}]   ;;  %s871_s2 = inlined_call_operand.vmem [shape: f32[8,1], index: 2, kind: input, shape index: {}]   ;;  %s872_s3 = inlined_call_operand.hbm [shape: f32[2,8,512], index: 3, kind: output, shape index: {}]  }
   0x1   :  { %10 = vsyncpa [#allocation3 + $0x1], 0 }
   0x2   :  { %11 = vsyncpa [#allocation4], 0 }
   0x3   :  { %13 = vsyncpa [#allocation4 + $0x1], 0  ;;  %s691_s12 = smov 0   ;;  %s693_s13 = smov 0  }
   0x4   :  { %s695_s14 = smov 0   ;;  %s697_s15 = smov 0  }
   0x5   :  { %s699_s16 = smov 0   ;;  %s701_s17 = smov 0  }
   0x6 LB: > { %s469_s18 = sadd.s32 4294967295, %s665_s17   ;;  %s470_s19 = sadd.s32 4294967294, %s665_s17   ;;  %s665_s17 = sphi %s701_s17, %s19_s17   ;;  %s661_s16 = sphi %s699_s16, %s888_s16   ;;  %s657_s15 = sphi %s697_s15, %s887_s15   ;;  %s653_s14 = sphi %s695_s14, %s886_s14   ;;  %s649_s13 = sphi %s693_s13, %s885_s13   ;;  %s645_s12 = sphi %s691_s12, %s884_s12  }
   0x7   : > { %s31_s20 = sadd.s32 1, %s661_s16  ;;  %s40_s21 = sadd.s32 1, %s653_s14 }
   0x8   : > { %p33_p0 = scmp.ge.s32.totalorder %s31_s20, 2  ;;  %p47_p1 = scmp.ne.s32.totalorder %s653_s14, %s649_s13 }
   0x9   : > { %p48_p2 = scmp.eq.s32.totalorder %s665_s17, 0  ;;  %p53_p3 = scmp.ne.s32.totalorder %s649_s13, %s645_s12 }
   0xa   : > { %s890_s20 = smov (%p33_p0, %s31_s20), 0  ;;  %p54_p5 = scmp.eq.s32.totalorder %s469_s18, 0 }
   0xb   : > { %p732_p4 = por %p48_p2, %p47_p1  ;;  %s35_s23 = ssub.s32 %s661_s16, %s890_s20 }
   0xc   : > { %p121_p6 = scmp.eq.s32.totalorder %s469_s18, 1  ;;  %p38_p7 = scmp.eq.s32.totalorder %s35_s23, 0 }
   0xd   : > { %p738_p8 = por %p54_p5, %p53_p3  ;;  %p127_p10 = scmp.eq.s32.totalorder %s470_s19, 1 }
   0xe   : > { %p742_p9 = por %p121_p6, %p47_p1  ;;  %p500_p13 = scmp.lt.s32.totalorder %s665_s17, 2 }
   0xf   : > { %s747_s26 = scalar_select %p38_p7, %s653_s14, %s40_s21  }
  0x10   : > { %s876_s25 = scalar_select %p742_p9, 1, 0 }
  0x11   : > { %p749_p11 = por %p127_p10, %p53_p3  ;;  %s153_s28 = sand.u32 1, %s653_s14  }
  0x12   : > { %s473_s29 = sshll.u32 %s153_s28, 5  ;;  %s486_s30 = sshll.u32 %s661_s16, 9 }
  0x13   : > { %s877_s27 = scalar_select %p749_p11, 1, 0 }
  0x14   : > { %s760_s6 = scalar_lea.hbm %s869_s0, %s486_s30  ;;  %s157_s7 = scalar_lea.vmem [#allocation2], %s473_s29 }
  0x15   : > { %s167_s8 = sshll.u32 %s157_s7, 4  ;;  %p766_p0 = pnand %p500_p13, %p732_p4  ;;  %s762_s8 = int_to_ptr.vmem [resolvable:$true] %s167_s8 }
  0x16   : > { %s154_s10 = scalar_lea.sflag [#allocation3], %s153_s28  ;;  %s553_s11 = scalar_lea.hbm %s760_s6, 512 }
  0x17   : > { %p554_p3 = scmp.ne.s32.totalorder %s760_s6, %s553_s11  ;;  %p555_p5 = pneg %p766_p0 }
  0x18   : > { %s558_s21 = scalar_lea.hbm %s869_s0, 1024  ;;  %p559_p4 = scmp.lt.u32.totalorder %s760_s6, %s869_s0 }
  0x19   : > { %p556_p6 = pnand %p555_p5, %p554_p3  ;;  %p560_p10 = scmp.lt.u32.totalorder %s558_s21, %s553_s11 }
  0x1a   : > { %p562_p12 = scmp.lt.u32.totalorder %s553_s11, %s760_s6 }
  0x1b   : > { %p557_p7 = pneg %p556_p6  ;;  %p561_p13 = por %p560_p10, %p559_p4 }
  0x1d   : > { %p563_p1 = por %p562_p12, %p561_p13 }
  0x1f   : > { %p564_p2 = pnand %p563_p1, %p557_p7 }
  0x21   : > { %567 = shalt.err (!%p564_p2)
}
  0x22   : > { %s568_s28 = scalar_lea.vmem %s762_s8, 512  ;;  %s667_s29 = smov [#allocation2]  }
  0x23   : > { %p569_p3 = scmp.ne.s32.totalorder %s762_s8, %s568_s28  ;;  %s573_s30 = sshll.u32 %s667_s29, 4  ;;  %s574_s30 = int_to_ptr.vmem [resolvable:$false] %s573_s30 }
  0x24   : > { %s575_s4 = scalar_lea.vmem %s574_s30, 1024  ;;  %p576_p9 = scmp.lt.s32.totalorder %s762_s8, %s574_s30 }
  0x25   : > { %p571_p6 = pnand %p569_p3, %p555_p5  ;;  %p577_p4 = scmp.lt.s32.totalorder %s575_s4, %s568_s28 }
  0x27   : > { %p572_p11 = pneg %p571_p6  ;;  %p578_p10 = por %p577_p4, %p576_p9 }
  0x29   : > { %p579_p12 = pnand %p578_p10, %p572_p11 }
  0x2b   : > { %582 = shalt.err (!%p579_p12)
}
  0x2c   : > { %495 = dma.hbm_to_vmem [thread:$0]  (!%p766_p0), %s760_s6, 512, %s762_s8, %s154_s10  }
  0x2d   : > { %p879_p1 = scmp.lt.s32.totalorder %s665_s17, 3  ;;  %p880_p2 = scmp.ge.s32.totalorder %s665_s17, 1 }
  0x2f   : > { %p173_p5 = pnand %p880_p2, %p879_p1 }
  0x30   : > { %s802_s5 = sand.u32 (!%p173_p5), 1, %s649_s13  }
  0x31   : > { %176 = sbr.rel (%p173_p5) target bundleno = 291 (0x123), region = 32  ;;  %s477_s7 = sshll.u32 (!%p173_p5), %s802_s5, 5 }
  0x32   : > { %s179_s11 = scalar_lea.sflag (!%p173_p5), [#allocation3], %s802_s5  ;;  %s182_s18 = scalar_lea.vmem (!%p173_p5), [#allocation2], %s477_s7 }
  0x38   : > { %636 = dma.done.wait (%p738_p8), %s179_s11, 512  }
  0x39   : > { %638 = vsyncadd (%p738_p8), %s179_s11, 4294966784  ;;  %v668_v0 = vmov 0.0   ;;  %v669_v1 = vmov 0   ;;  %v208_v2 = vld [vmem:[%s182_s18 + $0x8] sm:$0xff]  ;;  %v210_v3 = vld [vmem:[%s182_s18 + $0x18] sm:$0xff]  ;;  %vm218_vm0 = vcmask 64512  }
  0x3a   : > { %286 = vmatprep.mubr.f32.mxu0 %v668_v0  ;;  %357 = vmatprep.mubr.f32.mxu1 %v668_v0  ;;  %v207_v4 = vld [vmem:[%s182_s18] sm:$0xff]  ;;  %v209_v5 = vld [vmem:[%s182_s18 + $0x10] sm:$0xff]  ;;  %s487_s10 = sshll.u32 %s657_s15, 9  ;;  %s204_s19 = scalar_lea.vmem [#allocation5], %s477_s7 }
  0x3b   : > { %552 = vset.pattern.permute.xlu0 %v669_v1  ;;  %222 = vmatprep.subr.mxu0 %v208_v2  ;;  %v211_v6 = vld [vmem:[%s870_s1] sm:$0xff]  ;;  %s385_s21 = sshll.u32 %s204_s19, 4  ;;  %s820_s28 = scalar_lea.hbm %s872_s3, %s487_s10  ;;  %s822_s21 = int_to_ptr.vmem [resolvable:$true] %s385_s21 }
  0x3c   : > { %293 = vmatprep.subr.mxu1 %v210_v3  ;;  %v212_v7 = vld [vmem:[%s871_s2] sm:$0xff]  ;;  %223 = vmatpush1.msra.mxu0 %v207_v4  ;;  %s369_s15 = scalar_lea.sflag [#allocation4], %s802_s5  ;;  %s583_s29 = scalar_lea.vmem %s822_s21, 512 }
  0x3d   : > { %294 = vmatpush1.msra.mxu1 %v209_v5  ;;  %479 = vmatmul.mubr.msk.f32.vlgmr.msra.gmra.mrb[0].mxu0 %vm218_vm0, %v211_v6  ;;  %p584_p8 = scmp.ne.s32.totalorder %s822_s21, %s583_s29  ;;  %p881_p9 = scmp.ne.s32.totalorder %s876_s25, 0 }
  0x3e   : > { %480 = vmatmul.mubr.msk.f32.vlgmr.msra.gmra.mrb[0].mxu1 %vm218_vm0, %v211_v6  ;;  %215 = vperm.xlu0 %552, %v212_v7   ;;  %s670_s30 = smov [#allocation5]  }
  0x3f   : > { %p585_p11 = pnand %p584_p8, %p881_p9  ;;  %s587_s4 = sshll.u32 %s670_s30, 4  ;;  %s588_s4 = int_to_ptr.vmem [resolvable:$false] %s587_s4 }
  0x40   : > { %s589_s7 = scalar_lea.vmem %s588_s4, 1024  ;;  %p590_p7 = scmp.lt.s32.totalorder %s822_s21, %s588_s4 }
  0x41   : > { %p586_p0 = pneg %p585_p11  ;;  %p591_p13 = scmp.lt.s32.totalorder %s589_s7, %s583_s29 }
  0x43   : > { %p592_p3 = por %p591_p13, %p590_p7 }
  0x45   : > { %p593_p6 = pnand %p592_p3, %p586_p0 }
  0xbd   : > { %v216_v8 = vpop.permute.xlu0 %215 }
 0x110   : > { %v288_v9 = vpop.f32.mrb[0].mxu0 }
 0x111   : > { %v359_v10 = vpop.f32.mrb[0].mxu1  ;;  %v289_v11 = vadd.f32 %v288_v9, %v216_v8  ;;  %v290_v13 = vpop.f32.mrb[1].mxu0 }
 0x112   : > { %v360_v12 = vadd.f32 %v359_v10, %v216_v8  ;;  %v361_v14 = vpop.f32.mrb[1].mxu1  ;;  %v291_v15 = vadd.f32 %v290_v13, %v216_v8 }
 0x113   : > { %v362_v16 = vadd.f32 %v361_v14, %v216_v8  ;;  %364 = vst [vmem:[%s204_s19] sm:$0xff] %v289_v11 }
 0x114   : > { %366 = vst [vmem:[%s204_s19 + $0x10] sm:$0xff] %v360_v12  ;;  %365 = vst [vmem:[%s204_s19 + $0x8] sm:$0xff] %v291_v15 }
 0x115   : > { %367 = vst [vmem:[%s204_s19 + $0x18] sm:$0xff] %v362_v16 }
 0x116   : > { %596 = shalt.err (!%p593_p6)
}
 0x117   : > { %s597_s5 = scalar_lea.hbm %s820_s28, 512  ;;  %s601_s6 = scalar_lea.hbm %s872_s3, 1024 }
 0x118   : > { %p598_p4 = scmp.ne.s32.totalorder %s820_s28, %s597_s5  ;;  %p602_p1 = scmp.lt.u32.totalorder %s820_s28, %s872_s3 }
 0x119   : > { %p603_p2 = scmp.lt.u32.totalorder %s601_s6, %s597_s5  ;;  %p605_p8 = scmp.lt.u32.totalorder %s597_s5, %s820_s28 }
 0x11a   : > { %p599_p10 = pnand %p598_p4, %p881_p9 }
 0x11b   : > { %p604_p5 = por %p603_p2, %p602_p1 }
 0x11c   : > { %p600_p12 = pneg %p599_p10 }
 0x11d   : > { %p606_p11 = por %p605_p8, %p604_p5 }
 0x11f   : > { %p607_p0 = pnand %p606_p11, %p600_p12 }
 0x121   : > { %610 = shalt.err (!%p607_p0)
}
 0x122   : > { %490 = dma.vmem_to_hbm [thread:$0]  (%p881_p9), %s822_s21, 512, %s820_s28, %s369_s15  }
 0x123 PF: > { %s397_s24 = sand.u32 1, %s645_s12   ;;  %p882_p7 = scmp.ne.s32.totalorder %s877_s27, 0 }
 0x124   : > { %p883_p13 = scmp.ge.s32.totalorder %s665_s17, 2  ;;  %s398_s10 = scalar_lea.sflag [#allocation4], %s397_s24 }
 0x126   : > { %p497_p3 = pnand %p883_p13, %p882_p7 }
 0x128   : > { %640 = dma.done.wait (!%p497_p3), %s398_s10, 512  }
 0x129   : > { %642 = vsyncadd (!%p497_p3), %s398_s10, 4294966784  ;;  %s19_s17 = sadd.s32 1, %s665_s17   ;;  %s884_s12 = smov %s649_s13 }
 0x12a   : > { %p16_p6 = scmp.ge.s32.totalorder %s19_s17, 4   ;;  %s885_s13 = smov %s653_s14 }
 0x12b   : > { %s886_s14 = smov %s747_s26  ;;  %s887_s15 = smov %s661_s16 }
 0x12c   : > { %s888_s16 = smov %s890_s20  ;;  %18 = sbr.rel (!%p16_p6) target bundleno = 6 (0x6), region = 77 }
 0x133   :  { %403 = vsyncpa [#allocation3], 1 }
 0x134   :  { %405 = vsyncpa [#allocation3 + $0x1], 1 }
 0x135   :  { %406 = vsyncpa [#allocation4], 1 }
 0x136   :  { %408 = vsyncpa [#allocation4 + $0x1], 1 }

</bundles_post_ra>
